<compile_context>
chip_gen: v5e
topology: v5e:2x2
jax: 0.10.0
libtpu: 0.0.40
codegen_flags: <defaults>
</compile_context>

<pallas_src>
import functools
import math

import jax
import jax.numpy as jnp
from jax.experimental import pallas as pl
from jax.experimental.pallas import tpu as pltpu

_LANE = 128
_SUBLANE = 8
_LOG2 = math.log(2.0)


def _round_up(x, m):
    return ((x + m - 1) // m) * m


def _logcosh_rowsum_kernel(x_ref, y_ref, out_ref, acc_ref, *,
                           a, eps, c_valid, col_tile, ragged_cols,
                           single_col_tile, bf16_native):
    """Grid: (row_tiles, col_tiles); columns (last grid axis) = reduction axis.

    Accumulates per row  sum_c [ |a*d| + log(1 + t*(t + 2*eps)) ]  and rescales in
    finalize to  (acc - C*log2) * (1/a)  ==  sum_c log(cosh(a*d) + eps) / a.
    The /C mean and the final 'mean'/'sum' reduction are tiny and done in the
    wrapper.
    """
    j = pl.program_id(1)
    nj = pl.num_programs(1)

    # ---- per-element contribution: |a*d| + log(1 + t*(t + 2*eps)) -------------
    x = x_ref[...]
    y = y_ref[...]
    if bf16_native and x_ref.dtype == jnp.bfloat16:
        # v6e/v7x VPU handles bf16 natively: subtract/scale/abs at 2x rate, 1 cast.
        d = x - y
        az = jnp.abs(d if a == 1.0 else a * d).astype(jnp.float32)
    else:
        d = x.astype(jnp.float32) - y.astype(jnp.float32)
        az = jnp.abs(d if a == 1.0 else a * d)
    t = jnp.exp(-az)
    # Stable & exact:  log(cosh(z)+eps) = |z| - log2 + log(1 + t*(t + 2*eps)).
    # The -log2 and *(1/a) are hoisted out of the hot loop (applied in finalize).
    # jnp.log(1+u) kept (vs log1p): difference is immaterial for the loss value.
    elem = az + jnp.log(1.0 + t * (t + 2.0 * eps))

    if single_col_tile:
        # Whole reduction axis in one block: one cross-lane reduce, write out.
        s = jnp.sum(elem, axis=1, keepdims=True)
        out_ref[...] = (s - c_valid * _LOG2) * (1.0 / a)
        return

    # ---- multi column tiles: lane-wide partial accumulator --------------------
    @pl.when(j == 0)
    def _init():
        acc_ref[...] = jnp.zeros_like(acc_ref)

    k = col_tile // _LANE  # static; bounded (<=256) by _choose_tiles

    def _lane_fold(e):
        # (row_tile, k*128) -> (row_tile, 128) with vreg-aligned VPU adds only
        # (no reshape, no XLU, no masked stores in the hot loop).
        r = e[:, 0:_LANE]
        for q in range(1, k):
            r = r + e[:, q * _LANE:(q + 1) * _LANE]
        return r

    if ragged_cols:
        # Only the last column tile can contain out-of-bounds columns; gate the
        # iota/compare/select so interior tiles pay nothing for it.
        @pl.when(j < nj - 1)
        def _full():
            acc_ref[...] += _lane_fold(elem)

        @pl.when(j == nj - 1)
        def _masked():
            col = j * col_tile + jax.lax.broadcasted_iota(jnp.int32, elem.shape, 1)
            acc_ref[...] += _lane_fold(jnp.where(col < c_valid, elem, 0.0))
    else:
        acc_ref[...] += _lane_fold(elem)

    @pl.when(j == nj - 1)
    def _finalize():
        s = jnp.sum(acc_ref[...], axis=1, keepdims=True)
        out_ref[...] = (s - c_valid * _LOG2) * (1.0 / a)


def _fold_factor(n_rows, n_cols):
    # Fold column factors into rows (a free row-major reshape) when R is too small
    # to give the 'parallel' row axis multiple balanced tiles (v7x: 2 TensorCores);
    # keep >= 1024 columns per folded row for lane/DMA efficiency.
    fold = 1
    while (n_rows * fold < 1024
           and n_cols % (fold * 2) == 0
           and n_cols // (fold * 2) >= 1024):
        fold *= 2
    return fold


def _choose_tiles(n_rows, n_cols, itemsize, block_budget_bytes):
    # Row tile: full extent when tiny; otherwise split into >= 2 *balanced* tiles
    # (multiples of 8) so both v7x TensorCores get equal work (no 512+remainder
    # imbalance); cap ~512 rows to amortize grid-step overhead.
    max_row_tile = 512
    if n_rows < 2 * _SUBLANE:
        row_tile = n_rows
    else:
        n_row_tiles = max(2, pl.cdiv(n_rows, max_row_tile))
        row_tile = _round_up(pl.cdiv(n_rows, n_row_tiles), _SUBLANE)
    # Column tile: as much of the reduction axis as fits the per-block VMEM budget.
    col_budget = max(512, block_budget_bytes // max(1, row_tile * itemsize))
    if n_cols <= col_budget:
        col_tile = n_cols                      # whole reduction axis in one block
    else:
        # Multiple of 128 (lane width); >= 512 elems keeps >= 2 KiB DMA runs (v5e);
        # <= 256*128 bounds the statically unrolled lane-fold adds in the kernel.
        col_tile = min((col_budget // _LANE) * _LANE, 256 * _LANE)
    return row_tile, col_tile


def log_cosh_loss(inp, tgt, a=1.0, eps=1e-8, reduction="mean", *,
                  block_budget_bytes=4 * 1024 * 1024,
                  bf16_native_compute=False,
                  _row_tile=None, _col_tile=None):
    assert inp.shape == tgt.shape, "input/target shape mismatch"
    lead_shape = inp.shape[:-1]
    C = inp.shape[-1]
    R = 1
    for d in lead_shape:
        R *= d

    # 2-D view in native dtype (no upcast and no padded HBM copies).
    x2 = jnp.reshape(inp, (R, C))
    y2 = jnp.reshape(tgt, (R, C))

    fold = _fold_factor(R, C) if (_row_tile is None and _col_tile is None) else 1
    R2, C2 = R * fold, C // fold
    if fold > 1:
        x2 = jnp.reshape(x2, (R2, C2))
        y2 = jnp.reshape(y2, (R2, C2))

    itemsize = max(jnp.dtype(x2.dtype).itemsize, jnp.dtype(y2.dtype).itemsize)
    row_tile, col_tile = _choose_tiles(R2, C2, itemsize, block_budget_bytes)
    if _row_tile is not None:
        row_tile = _row_tile
    if _col_tile is not None:
        col_tile = _col_tile

    n_row_tiles = pl.cdiv(R2, row_tile)
    n_col_tiles = pl.cdiv(C2, col_tile)
    single_col_tile = n_col_tiles == 1
    ragged_cols = (n_col_tiles * col_tile) != C2
    if not single_col_tile:
        assert col_tile % _LANE == 0, "multi-tile reduction needs 128-multiple col_tile"

    kernel = functools.partial(
        _logcosh_rowsum_kernel,
        a=float(a), eps=float(eps), c_valid=C2,
        col_tile=col_tile, ragged_cols=ragged_cols,
        single_col_tile=single_col_tile, bf16_native=bool(bf16_native_compute),
    )

    # Explicit scoped-VMEM limit: 2 inputs x 2 pipeline buffers x block + the
    # lane-wide accumulator + the (row_tile, 1) output, plus headroom.  24 MiB floor
    # covers defaults; 56 MiB cap stays inside v7x's 64 MiB physical VMEM per TC.
    vmem_bytes = (2 * 2 * row_tile * col_tile * itemsize
                  + row_tile * _LANE * 4
                  + 2 * row_tile * 4)
    vmem_limit = int(min(56 << 20, max(24 << 20, vmem_bytes + (8 << 20))))

    cost = pl.CostEstimate(
        flops=8 * R2 * C2,
        transcendentals=2 * R2 * C2,
        bytes_accessed=2 * R2 * C2 * itemsize + 4 * R2,
    )

    row_sums = pl.pallas_call(
        kernel,
        out_shape=jax.ShapeDtypeStruct((R2, 1), jnp.float32),
        grid_spec=pltpu.PrefetchScalarGridSpec(
            num_scalar_prefetch=0,
            grid=(n_row_tiles, n_col_tiles),
            in_specs=[
                pl.BlockSpec((row_tile, col_tile), lambda i, j: (i, j)),
                pl.BlockSpec((row_tile, col_tile), lambda i, j: (i, j)),
            ],
            out_specs=pl.BlockSpec((row_tile, 1), lambda i, j: (i, 0)),
            scratch_shapes=[pltpu.VMEM((row_tile, _LANE), jnp.float32)],
        ),
        compiler_params=pltpu.CompilerParams(
            dimension_semantics=("parallel", "arbitrary"),
            vmem_limit_bytes=vmem_limit,
        ),
        cost_estimate=cost,
    )(x2, y2)

    # Undo the fold and finish the mean over the original last axis (tiny: R elems).
    losses = jnp.reshape(row_sums[:, 0], (R, fold)).sum(axis=1) * (1.0 / C)
    losses = jnp.reshape(losses, lead_shape)

    if reduction == "mean":
        return jnp.mean(losses)
    elif reduction == "sum":
        return jnp.sum(losses)
    elif reduction == "none":
        return losses
    else:
        raise ValueError(f"unknown reduction: {reduction}")


def _reference(inp, tgt, a, eps, reduction):
    d = inp.astype(jnp.float32) - tgt.astype(jnp.float32)
    losses = jnp.mean((1.0 / a) * jnp.log(jnp.cosh(a * d) + eps), axis=-1)
    if reduction == "mean":
        return jnp.mean(losses)
    if reduction == "sum":
        return jnp.sum(losses)
    return losses


if __name__ == "__main__":
    def check(idx, shape, dtype=jnp.float32, a=1.0, eps=1e-8, reduction="mean",
              rtol=1e-5, atol=1e-6, **kw):
        k1, k2 = jax.random.split(jax.random.fold_in(jax.random.PRNGKey(0), idx))
        inp = jax.random.normal(k1, shape, dtype=jnp.float32).astype(dtype)
        tgt = jax.random.normal(k2, shape, dtype=jnp.float32).astype(dtype)
        out = jax.block_until_ready(
            log_cosh_loss(inp, tgt, a=a, eps=eps, reduction=reduction, **kw))
        ref = _reference(inp, tgt, a, eps, reduction)
        assert jnp.allclose(out, ref, rtol=rtol, atol=atol), (shape, dtype, out, ref)

    # (batch, nchs, seq) time-domain signals; seq deliberately not a multiple of 128.
    check(0, (2, 4, 200))                                   # single-block fast path
    check(1, (2, 4, 200), a=0.5, reduction="sum")           # a != 1 rescale path
    check(2, (2, 4, 200), reduction="none")
    # Forced small tiles: multi-tile lane-wide accumulation, the gated ragged column
    # mask (200 = 128 + 72) and a ragged row edge block (15 = 8 + 7).
    check(3, (3, 5, 200), a=0.5, _row_tile=8, _col_tile=128)
    # Column->row folding path (small R, longer seq).
    check(4, (1, 2, 4096))
    # Balanced 2-way 'parallel' row split (R2 = 128 -> two 64-row tiles).
    check(5, (16, 8, 512))
    # Native bf16 inputs flow through the kernel with no HBM upcast pass.
    check(6, (2, 4, 200), dtype=jnp.bfloat16, rtol=1e-4, atol=1e-5)
    # Optional bf16-native subtract/scale/abs (tiny rounding deviation vs reference).
    check(7, (2, 4, 200), dtype=jnp.bfloat16, bf16_native_compute=True,
          rtol=5e-3, atol=1e-3)

    # Also make sure it composes under jit.
    k1, k2 = jax.random.split(jax.random.fold_in(jax.random.PRNGKey(0), 8))
    inp = jax.random.normal(k1, (2, 4, 200), dtype=jnp.float32)
    tgt = jax.random.normal(k2, (2, 4, 200), dtype=jnp.float32)
    out = jax.block_until_ready(jax.jit(log_cosh_loss)(inp, tgt))
    ref = _reference(inp, tgt, 1.0, 1e-8, "mean")
    assert jnp.allclose(out, ref, rtol=1e-5, atol=1e-6), (out, ref)

    print("KERNEL_OK")
</pallas_src>

<mosaic_0001>
module attributes {stable_mosaic.version = 11 : i64} {
  func.func @_logcosh_rowsum_kernel(%arg0: i32, %arg1: i32, %arg2: memref<8x200xf32, #tpu.memory_space<vmem>>, %arg3: memref<8x200xf32, #tpu.memory_space<vmem>>, %arg4: memref<8x1xf32, #tpu.memory_space<vmem>>, %arg5: memref<8x128xf32, #tpu.memory_space<vmem>>) attributes {dimension_semantics = [#tpu.dimension_semantics<parallel>, #tpu.dimension_semantics<arbitrary>], iteration_bounds = array<i64: 1, 1>, scalar_prefetch = 0 : i64, scratch_operands = 1 : i64, tpu.core_type = #tpu.core_type<tc>, window_params = [{transform_indices = @transform_0, window_bounds = array<i64: 8, 200>}, {transform_indices = @transform_1, window_bounds = array<i64: 8, 200>}, {transform_indices = @transform_2, window_bounds = array<i64: 8, 1>}]} {
    %c0 = arith.constant 0 : index
    %c0_0 = arith.constant 0 : index
    %0 = vector.load %arg2[%c0, %c0_0] : memref<8x200xf32, #tpu.memory_space<vmem>>, vector<8x200xf32>
    %c0_1 = arith.constant 0 : index
    %c0_2 = arith.constant 0 : index
    %1 = vector.load %arg3[%c0_1, %c0_2] : memref<8x200xf32, #tpu.memory_space<vmem>>, vector<8x200xf32>
    %2 = arith.subf %0, %1 : vector<8x200xf32>
    %3 = math.absf %2 : vector<8x200xf32>
    %cst = arith.constant 0.000000e+00 : f32
    %4 = vector.broadcast %cst : f32 to vector<8x200xf32>
    %5 = arith.subf %4, %3 : vector<8x200xf32>
    %6 = math.exp %5 : vector<8x200xf32>
    %cst_3 = arith.constant 2.000000e-08 : f32
    %7 = vector.broadcast %cst_3 : f32 to vector<8x200xf32>
    %8 = arith.addf %6, %7 : vector<8x200xf32>
    %9 = arith.mulf %6, %8 : vector<8x200xf32>
    %cst_4 = arith.constant 1.000000e+00 : f32
    %10 = vector.broadcast %cst_4 : f32 to vector<8x200xf32>
    %11 = arith.addf %10, %9 : vector<8x200xf32>
    %12 = math.log %11 : vector<8x200xf32>
    %13 = arith.addf %3, %12 : vector<8x200xf32>
    %cst_5 = arith.constant dense<0.000000e+00> : vector<8xf32>
    %14 = vector.multi_reduction <add>, %13, %cst_5 [1] : vector<8x200xf32> to vector<8xf32>
    %15 = vector.shape_cast %14 : vector<8xf32> to vector<8x1xf32>
    %cst_6 = arith.constant 138.62944 : f32
    %16 = vector.broadcast %cst_6 : f32 to vector<8x1xf32>
    %17 = arith.subf %15, %16 : vector<8x1xf32>
    %cst_7 = arith.constant 1.000000e+00 : f32
    %18 = vector.broadcast %cst_7 : f32 to vector<8x1xf32>
    %19 = arith.mulf %17, %18 : vector<8x1xf32>
    %c0_8 = arith.constant 0 : index
    %c0_9 = arith.constant 0 : index
    %20 = vector.load %arg4[%c0_8, %c0_9] : memref<8x1xf32, #tpu.memory_space<vmem>>, vector<8x1xf32>
    tpu.vector_store %arg4[%c0_8, %c0_9], %19 {strides = array<i32>} : memref<8x1xf32, #tpu.memory_space<vmem>>, vector<8x1xf32>,
    return
  }
  func.func @transform_0(%arg0: i32, %arg1: i32) -> (i32, i32) {
    %c0_i32 = arith.constant 0 : i32
    return %arg0, %arg1 : i32, i32
  }
  func.func @transform_1(%arg0: i32, %arg1: i32) -> (i32, i32) {
    %c0_i32 = arith.constant 0 : i32
    return %arg0, %arg1 : i32, i32
  }
  func.func @transform_2(%arg0: i32, %arg1: i32) -> (i32, i32) {
    %c0_i32 = arith.constant 0 : i32
    %c0_i32_0 = arith.constant 0 : i32
    return %arg0, %c0_i32 : i32, i32
  }
}

</mosaic_0001>

<bundles_post_ra>
// kernel: tpu_custom_call.1
= control target key start
LH: loop header
LB: loop body
LE: loop exit
PB: predicated region body
PF: predicated region fallthrough
CT: control target
= control target key end

     0   :  { %7 = vsyncpa [#allocation4], 0  ;;  %s168_s0 = inlined_call_operand.hbm [shape: f32[8,200], index: 0, kind: input, shape index: {}]   ;;  %s169_s1 = inlined_call_operand.hbm [shape: f32[8,200], index: 1, kind: input, shape index: {}]   ;;  %s170_s2 = inlined_call_operand.vmem [shape: f32[8,1], index: 2, kind: output, shape index: {}]  }
   0x1   :  { %s14_s11 = sshll.u32 %s168_s0, 4  ;;  %s15_s11 = int_to_ptr.hbm [resolvable:$true] %s14_s11 }
   0x2   :  { %8 = vsyncpa [#allocation6], 0  ;;  %s142_s12 = smov [#allocation3]   ;;  %s25_s16 = sshll.u32 %s169_s1, 4  ;;  %s26_s16 = int_to_ptr.hbm [resolvable:$true] %s25_s16 }
   0x3   :  { %s16_s13 = sshll.u32 %s142_s12, 4  ;;  %s143_s17 = smov [#allocation5]   ;;  %s17_s13 = int_to_ptr.vmem [resolvable:$true] %s16_s13 }
   0x4   :  { %19 = dma.hbm_to_vmem [thread:$0]  %s15_s11, 256, %s17_s13, [#allocation4]  }
   0x5   :  { %s27_s18 = sshll.u32 %s143_s17, 4  ;;  %s28_s18 = int_to_ptr.vmem [resolvable:$true] %s27_s18 }
   0x6   :  { %30 = dma.hbm_to_vmem [thread:$0]  %s26_s16, 256, %s28_s18, [#allocation6]  }
   0x7   :  { %138 = dma.done.wait [#allocation4], 256  }
   0x8   :  { %139 = vsyncadd [#allocation4], 4294967040 }
   0x9   :  { %140 = dma.done.wait [#allocation6], 256  }
   0xa   :  { %141 = vsyncadd [#allocation6], 4294967040  ;;  %v39_v0 = vld [vmem:[#allocation3] sm:$0xff]  ;;  %v40_v1 = vld [vmem:[#allocation3 + $0x8] sm:$0xff]  ;;  %vm65_vm0 = vcmask 588800   ;;  %vm71_vm1 = vcmask 7168  }
   0xb   :  { %v41_v2 = vld [vmem:[#allocation5] sm:$0xff]  ;;  %v42_v3 = vld [vmem:[#allocation5 + $0x8] sm:$0xff] }
   0xc   :  { %v43_v4 = vsub.f32 %v39_v0, %v41_v2  ;;  %v44_v5 = vsub.f32 %v40_v1, %v42_v3 }
   0xe   :  { %v45_v6 = vand.u32 2147483647, %v43_v4  ;;  %v46_v7 = vand.u32 2147483647, %v44_v5 }
  0x10   :  { %v47_v8 = vsub.f32 0.0, %v45_v6  ;;  %v48_v9 = vsub.f32 0.0, %v46_v7 }
  0x12   :  { %v49_v10 = vmul.f32 1.442695, %v47_v8  ;;  %v51_v11 = vmul.f32 1.442695, %v48_v9 }
  0x14   :  { %82 = vpow2.f32 %v49_v10 }
  0x15   :  { %84 = vpow2.f32 %v51_v11 }
  0x1a   :  { %v83_v12 = vpop.eup %82 }
  0x1b   :  { %v85_v13 = vpop.eup %84  ;;  %v53_v14 = vadd.f32 2e-08, %v83_v12 }
  0x1c   :  { %v54_v15 = vadd.f32 2e-08, %v85_v13 }
  0x1d   :  { %v55_v16 = vmul.f32 %v83_v12, %v53_v14 }
  0x1e   :  { %v56_v17 = vmul.f32 %v85_v13, %v54_v15 }
  0x1f   :  { %v57_v18 = vadd.f32 1.0, %v55_v16 }
  0x20   :  { %v58_v19 = vadd.f32 1.0, %v56_v17 }
  0x21   :  { %86 = vlog2.f32 %v57_v18 }
  0x22   :  { %88 = vlog2.f32 %v58_v19 }
  0x27   :  { %v87_v20 = vpop.eup %86 }
  0x28   :  { %v89_v21 = vpop.eup %88  ;;  %v60_v22 = vmul.f32 0.6931472, %v87_v20 }
  0x29   :  { %v62_v23 = vmul.f32 0.6931472, %v89_v21 }
  0x2a   :  { %v63_v24 = vadd.f32 %v60_v22, %v45_v6 }
  0x2b   :  { %v64_v25 = vadd.f32 %v62_v23, %v46_v7 }
  0x2d   :  { %v66_v26 = vsel %vm65_vm0, %v64_v25, 0.0 }
  0x2e   :  { %v67_v27 = vadd.f32 %v66_v26, %v63_v24 }
  0x30   :  { %68 = vadd.xlane.f32.xlu0 %v67_v27 }
  0xa3   :  { %v69_v28 = vpop.xlane.xlu0 %68 }
  0xa4   :  { %v79_v29 = vadd.f32 -138.62944, %v69_v28 }
  0xa6   :  { %72 = vst.msk [vmem:[%s170_s2] sm:$0xff] %vm71_vm1, %v79_v29 }
  0xa7   :  { %77 = vsyncpa [#allocation4], 1 }
  0xa8   :  { %78 = vsyncpa [#allocation6], 1 }

</bundles_post_ra>
